<compile_context>
chip_gen: v5e
topology: v5e:2x2
jax: 0.10.0
libtpu: 0.0.40
codegen_flags: <defaults>
</compile_context>

<pallas_src>
import jax
import jax.numpy as jnp
from jax.experimental import pallas as pl
from jax.experimental.pallas import tpu as pltpu

LN_EPS = 1e-5  # PyTorch nn.LayerNorm default


def _ffn_kernel(x_ref, w1_ref, b1_ref, w2_ref, b2_ref, gamma_ref, beta_ref,
                o_ref):
    x_in = x_ref[...]                                        # (TM, D), native dtype

    # fc1 + relu   (MXU matmul, f32 accumulate; operands stay in native dtype)
    h = jnp.dot(x_in, w1_ref[...], preferred_element_type=jnp.float32)
    h = jnp.maximum(h + b1_ref[...].astype(jnp.float32), 0.0)   # (TM, H)

    # fc2 (cast the f32 activation back to the weight dtype so bf16 weights
    # keep the bf16 MXU path; no-op for f32)
    y = jnp.dot(h.astype(w2_ref.dtype), w2_ref[...],
                preferred_element_type=jnp.float32)
    y = y + b2_ref[...].astype(jnp.float32)                     # (TM, D)

    # dropout(p=0.0) is identity; residual add (f32)
    y = y + x_in.astype(jnp.float32)

    # LayerNorm over last axis (dim_model), f32 math
    mean = jnp.mean(y, axis=-1, keepdims=True)
    centered = y - mean
    var = jnp.mean(centered * centered, axis=-1, keepdims=True)
    normed = centered * jax.lax.rsqrt(var + LN_EPS)
    out = normed * gamma_ref[...].astype(jnp.float32) + beta_ref[...].astype(jnp.float32)

    o_ref[...] = out.astype(o_ref.dtype)


def _round_up(a, b):
    return (a + b - 1) // b * b


def position_wise_feed_forward(x, w1, b1, w2, b2, gamma, beta, *, block_m=256):
    """x: (batch, seq, dim_model). Returns same shape/dtype."""
    batch, seq, dim_model = x.shape
    hidden = w1.shape[1]
    M = batch * seq

    x2d = x.reshape(M, dim_model)

    # Row tile: MXU-friendly (>=8-aligned, up to block_m rows), never larger
    # than the (8-padded) problem.
    tm = min(block_m, _round_up(M, 8))
    m_pad = _round_up(M, tm)
    if m_pad != M:
        x2d = jnp.pad(x2d, ((0, m_pad - M), (0, 0)))
    grid_m = m_pad // tm

    # Keep biases / affine params 2-D so they map cleanly onto (sublane, lane).
    b1_2d = b1.reshape(1, hidden)
    b2_2d = b2.reshape(1, dim_model)
    gamma_2d = gamma.reshape(1, dim_model)
    beta_2d = beta.reshape(1, dim_model)

    # Resident blocks: constant block index -> DMA'd once, stays in VMEM
    # across all grid steps.
    def resident(shape):
        return pl.BlockSpec(shape, lambda i, _s=shape: tuple(0 for _ in _s))

    row_spec = pl.BlockSpec((tm, dim_model), lambda i: (i, 0))

    itemsize = jnp.dtype(x.dtype).itemsize
    w_itemsize = jnp.dtype(w1.dtype).itemsize

    # Advisory cost estimate for XLA's scheduler.
    flops = 2 * 2 * m_pad * dim_model * hidden            # two matmuls
    bytes_accessed = (
        2 * m_pad * dim_model * itemsize                   # x in + out
        + 2 * dim_model * hidden * w_itemsize              # W1 + W2
        + (hidden + 3 * dim_model) * 4                     # b1, b2, gamma, beta
    )

    # VMEM budget: double-buffered x/out row tiles + resident weights/vectors
    # + the (tm, hidden) f32 activation, with 2x headroom; clamp to sane range.
    vmem_bytes = (
        2 * 2 * tm * dim_model * itemsize
        + 2 * dim_model * hidden * w_itemsize
        + tm * hidden * 4
        + 4 * (hidden + 3 * dim_model) * 4
    )
    vmem_limit = min(max(2 * vmem_bytes, 16 * 1024 * 1024), 64 * 1024 * 1024)

    out2d = pl.pallas_call(
        _ffn_kernel,
        out_shape=jax.ShapeDtypeStruct((m_pad, dim_model), x.dtype),
        grid=(grid_m,),
        in_specs=[
            row_spec,                           # x       (tiled over M)
            resident((dim_model, hidden)),      # W1      (resident)
            resident((1, hidden)),              # b1      (resident)
            resident((hidden, dim_model)),      # W2      (resident)
            resident((1, dim_model)),           # b2      (resident)
            resident((1, dim_model)),           # gamma   (resident)
            resident((1, dim_model)),           # beta    (resident)
        ],
        out_specs=row_spec,
        compiler_params=pltpu.CompilerParams(
            dimension_semantics=("parallel",),
            vmem_limit_bytes=vmem_limit,
        ),
        cost_estimate=pl.CostEstimate(
            flops=flops, transcendentals=m_pad, bytes_accessed=bytes_accessed),
    )(x2d, w1, b1_2d, w2, b2_2d, gamma_2d, beta_2d)

    return out2d[:M].reshape(batch, seq, dim_model)


def _reference(x, w1, b1, w2, b2, gamma, beta):
    h = jnp.maximum(x @ w1 + b1, 0.0)
    y = h @ w2 + b2
    y = y + x
    mean = jnp.mean(y, axis=-1, keepdims=True)
    var = jnp.mean((y - mean) ** 2, axis=-1, keepdims=True)
    return (y - mean) * jax.lax.rsqrt(var + LN_EPS) * gamma + beta


if __name__ == "__main__":
    batch, seq, dim_model, hidden = 2, 8, 32, 64

    key = jax.random.PRNGKey(0)
    kx, k1, k2, k3, k4 = jax.random.split(key, 5)

    x = jax.random.normal(kx, (batch, seq, dim_model), dtype=jnp.float32)

    # Deterministic parameter init (shapes from nn.Linear / nn.LayerNorm),
    # stored as (in, out) so the kernel does x @ W (== x @ weight.T in torch).
    w1 = jax.random.normal(k1, (dim_model, hidden), dtype=jnp.float32) * 0.1
    b1 = jax.random.normal(k2, (hidden,), dtype=jnp.float32) * 0.1
    w2 = jax.random.normal(k3, (hidden, dim_model), dtype=jnp.float32) * 0.1
    b2 = jax.random.normal(k4, (dim_model,), dtype=jnp.float32) * 0.1
    gamma = jnp.ones((dim_model,), dtype=jnp.float32)
    beta = jnp.zeros((dim_model,), dtype=jnp.float32)

    out = position_wise_feed_forward(x, w1, b1, w2, b2, gamma, beta)
    out = jax.block_until_ready(out)

    ref = _reference(x, w1, b1, w2, b2, gamma, beta)
    assert out.shape == x.shape and out.dtype == x.dtype
    assert jnp.allclose(out, ref, atol=1e-4, rtol=1e-4)

    print("KERNEL_OK")
</pallas_src>

<mosaic_0001>
module attributes {stable_mosaic.version = 11 : i64} {
  func.func @_ffn_kernel(%arg0: i32, %arg1: memref<16x32xf32, #tpu.memory_space<vmem>>, %arg2: memref<32x64xf32, #tpu.memory_space<vmem>>, %arg3: memref<1x64xf32, #tpu.memory_space<vmem>>, %arg4: memref<64x32xf32, #tpu.memory_space<vmem>>, %arg5: memref<1x32xf32, #tpu.memory_space<vmem>>, %arg6: memref<1x32xf32, #tpu.memory_space<vmem>>, %arg7: memref<1x32xf32, #tpu.memory_space<vmem>>, %arg8: memref<16x32xf32, #tpu.memory_space<vmem>>) attributes {dimension_semantics = [#tpu.dimension_semantics<parallel>], iteration_bounds = array<i64: 1>, scalar_prefetch = 0 : i64, scratch_operands = 0 : i64, tpu.core_type = #tpu.core_type<tc>, window_params = [{transform_indices = @transform_0, window_bounds = array<i64: 16, 32>}, {pipeline_mode = #tpu.pipeline_mode<synchronous>, transform_indices = @transform_1, window_bounds = array<i64: 32, 64>}, {pipeline_mode = #tpu.pipeline_mode<synchronous>, transform_indices = @transform_2, window_bounds = array<i64: 1, 64>}, {pipeline_mode = #tpu.pipeline_mode<synchronous>, transform_indices = @transform_3, window_bounds = array<i64: 64, 32>}, {pipeline_mode = #tpu.pipeline_mode<synchronous>, transform_indices = @transform_4, window_bounds = array<i64: 1, 32>}, {pipeline_mode = #tpu.pipeline_mode<synchronous>, transform_indices = @transform_5, window_bounds = array<i64: 1, 32>}, {pipeline_mode = #tpu.pipeline_mode<synchronous>, transform_indices = @transform_6, window_bounds = array<i64: 1, 32>}, {transform_indices = @transform_7, window_bounds = array<i64: 16, 32>}]} {
    %c0 = arith.constant 0 : index
    %c0_0 = arith.constant 0 : index
    %0 = vector.load %arg1[%c0, %c0_0] : memref<16x32xf32, #tpu.memory_space<vmem>>, vector<16x32xf32>
    %c0_1 = arith.constant 0 : index
    %c0_2 = arith.constant 0 : index
    %1 = vector.load %arg2[%c0_1, %c0_2] : memref<32x64xf32, #tpu.memory_space<vmem>>, vector<32x64xf32>
    %cst = arith.constant dense<0.000000e+00> : vector<16x64xf32>
    %2 = tpu.matmul %0, %1, %cst {dimension_numbers = #tpu.dot_dimension_numbers<[1], [0], [0], [1], [0, 0, 1, 1], [], []>} : vector<16x32xf32>, vector<32x64xf32>, vector<16x64xf32> -> vector<16x64xf32>
    %c0_3 = arith.constant 0 : index
    %c0_4 = arith.constant 0 : index
    %3 = vector.load %arg3[%c0_3, %c0_4] : memref<1x64xf32, #tpu.memory_space<vmem>>, vector<1x64xf32>
    %4 = vector.broadcast %3 : vector<1x64xf32> to vector<16x64xf32>
    %5 = arith.addf %2, %4 : vector<16x64xf32>
    %cst_5 = arith.constant 0.000000e+00 : f32
    %6 = vector.broadcast %cst_5 : f32 to vector<16x64xf32>
    %7 = arith.maximumf %5, %6 : vector<16x64xf32>
    %c0_6 = arith.constant 0 : index
    %c0_7 = arith.constant 0 : index
    %8 = vector.load %arg4[%c0_6, %c0_7] : memref<64x32xf32, #tpu.memory_space<vmem>>, vector<64x32xf32>
    %cst_8 = arith.constant dense<0.000000e+00> : vector<16x32xf32>
    %9 = tpu.matmul %7, %8, %cst_8 {dimension_numbers = #tpu.dot_dimension_numbers<[1], [0], [0], [1], [0, 0, 1, 1], [], []>} : vector<16x64xf32>, vector<64x32xf32>, vector<16x32xf32> -> vector<16x32xf32>
    %c0_9 = arith.constant 0 : index
    %c0_10 = arith.constant 0 : index
    %10 = vector.load %arg5[%c0_9, %c0_10] : memref<1x32xf32, #tpu.memory_space<vmem>>, vector<1x32xf32>
    %11 = vector.broadcast %10 : vector<1x32xf32> to vector<16x32xf32>
    %12 = arith.addf %9, %11 : vector<16x32xf32>
    %13 = arith.addf %12, %0 : vector<16x32xf32>
    %cst_11 = arith.constant dense<0.000000e+00> : vector<16xf32>
    %14 = vector.multi_reduction <add>, %13, %cst_11 [1] : vector<16x32xf32> to vector<16xf32>
    %15 = vector.shape_cast %14 : vector<16xf32> to vector<16x1xf32>
    %cst_12 = arith.constant 3.200000e+01 : f32
    %16 = vector.broadcast %cst_12 : f32 to vector<16x1xf32>
    %17 = arith.divf %15, %16 : vector<16x1xf32>
    %18 = vector.broadcast %17 : vector<16x1xf32> to vector<16x32xf32>
    %19 = arith.subf %13, %18 : vector<16x32xf32>
    %20 = arith.mulf %19, %19 : vector<16x32xf32>
    %cst_13 = arith.constant dense<0.000000e+00> : vector<16xf32>
    %21 = vector.multi_reduction <add>, %20, %cst_13 [1] : vector<16x32xf32> to vector<16xf32>
    %22 = vector.shape_cast %21 : vector<16xf32> to vector<16x1xf32>
    %cst_14 = arith.constant 3.200000e+01 : f32
    %23 = vector.broadcast %cst_14 : f32 to vector<16x1xf32>
    %24 = arith.divf %22, %23 : vector<16x1xf32>
    %cst_15 = arith.constant 9.99999974E-6 : f32
    %25 = vector.broadcast %cst_15 : f32 to vector<16x1xf32>
    %26 = arith.addf %24, %25 : vector<16x1xf32>
    %27 = math.rsqrt %26 : vector<16x1xf32>
    %28 = vector.broadcast %27 : vector<16x1xf32> to vector<16x32xf32>
    %29 = arith.mulf %19, %28 : vector<16x32xf32>
    %c0_16 = arith.constant 0 : index
    %c0_17 = arith.constant 0 : index
    %30 = vector.load %arg6[%c0_16, %c0_17] : memref<1x32xf32, #tpu.memory_space<vmem>>, vector<1x32xf32>
    %31 = vector.broadcast %30 : vector<1x32xf32> to vector<16x32xf32>
    %32 = arith.mulf %29, %31 : vector<16x32xf32>
    %c0_18 = arith.constant 0 : index
    %c0_19 = arith.constant 0 : index
    %33 = vector.load %arg7[%c0_18, %c0_19] : memref<1x32xf32, #tpu.memory_space<vmem>>, vector<1x32xf32>
    %34 = vector.broadcast %33 : vector<1x32xf32> to vector<16x32xf32>
    %35 = arith.addf %32, %34 : vector<16x32xf32>
    %c0_20 = arith.constant 0 : index
    %c0_21 = arith.constant 0 : index
    %36 = vector.load %arg8[%c0_20, %c0_21] : memref<16x32xf32, #tpu.memory_space<vmem>>, vector<16x32xf32>
    tpu.vector_store %arg8[%c0_20, %c0_21], %35 {strides = array<i32>} : memref<16x32xf32, #tpu.memory_space<vmem>>, vector<16x32xf32>,
    return
  }
  func.func @transform_0(%arg0: i32) -> (i32, i32) {
    %c0_i32 = arith.constant 0 : i32
    %c0_i32_0 = arith.constant 0 : i32
    return %arg0, %c0_i32 : i32, i32
  }
  func.func @transform_1(%arg0: i32) -> (i32, i32) {
    %c0_i32 = arith.constant 0 : i32
    %c0_i32_0 = arith.constant 0 : i32
    %c0_i32_1 = arith.constant 0 : i32
    return %c0_i32, %c0_i32_0 : i32, i32
  }
  func.func @transform_2(%arg0: i32) -> (i32, i32) {
    %c0_i32 = arith.constant 0 : i32
    %c0_i32_0 = arith.constant 0 : i32
    %c0_i32_1 = arith.constant 0 : i32
    return %c0_i32, %c0_i32_0 : i32, i32
  }
  func.func @transform_3(%arg0: i32) -> (i32, i32) {
    %c0_i32 = arith.constant 0 : i32
    %c0_i32_0 = arith.constant 0 : i32
    %c0_i32_1 = arith.constant 0 : i32
    return %c0_i32, %c0_i32_0 : i32, i32
  }
  func.func @transform_4(%arg0: i32) -> (i32, i32) {
    %c0_i32 = arith.constant 0 : i32
    %c0_i32_0 = arith.constant 0 : i32
    %c0_i32_1 = arith.constant 0 : i32
    return %c0_i32, %c0_i32_0 : i32, i32
  }
  func.func @transform_5(%arg0: i32) -> (i32, i32) {
    %c0_i32 = arith.constant 0 : i32
    %c0_i32_0 = arith.constant 0 : i32
    %c0_i32_1 = arith.constant 0 : i32
    return %c0_i32, %c0_i32_0 : i32, i32
  }
  func.func @transform_6(%arg0: i32) -> (i32, i32) {
    %c0_i32 = arith.constant 0 : i32
    %c0_i32_0 = arith.constant 0 : i32
    %c0_i32_1 = arith.constant 0 : i32
    return %c0_i32, %c0_i32_0 : i32, i32
  }
  func.func @transform_7(%arg0: i32) -> (i32, i32) {
    %c0_i32 = arith.constant 0 : i32
    %c0_i32_0 = arith.constant 0 : i32
    return %arg0, %c0_i32 : i32, i32
  }
}

</mosaic_0001>

<bundles_post_ra>
// kernel: tpu_custom_call.1
= control target key start
LH: loop header
LB: loop body
LE: loop exit
PB: predicated region body
PF: predicated region fallthrough
CT: control target
= control target key end

     0   :  { %vm37_vm0 = vcmask 261120   ;;  %s361_s0 = inlined_call_operand.vmem [shape: f32[16,32], index: 0, kind: input, shape index: {}]   ;;  %s362_s1 = inlined_call_operand.vmem [shape: f32[32,64], index: 1, kind: input, shape index: {}]   ;;  %s363_s2 = inlined_call_operand.vmem [shape: f32[1,64], index: 2, kind: input, shape index: {}]   ;;  %s364_s3 = inlined_call_operand.vmem [shape: f32[64,32], index: 3, kind: input, shape index: {}]   ;;  %s365_s4 = inlined_call_operand.vmem [shape: f32[1,32], index: 4, kind: input, shape index: {}]   ;;  %s366_s5 = inlined_call_operand.vmem [shape: f32[1,32], index: 5, kind: input, shape index: {}]   ;;  %s367_s6 = inlined_call_operand.vmem [shape: f32[1,32], index: 6, kind: input, shape index: {}]   ;;  %s368_s7 = inlined_call_operand.hbm [shape: f32[16,32], index: 7, kind: output, shape index: {}]  }
   0x1   :  { %v32_v0 = vld [vmem:[%s362_s1 + $0x18] sm:$0xff]  ;;  %v31_v1 = vld [vmem:[%s362_s1 + $0x10] sm:$0xff]  ;;  %v30_v2 = vld [vmem:[%s362_s1 + $0x8] sm:$0xff] }
   0x2   :  { %56 = vmatpush.msra.mxu0 %v32_v0  ;;  %200 = vmatpush.msra.mxu3 %v32_v0  ;;  %v76_v3 = vld [vmem:[%s364_s3 + $0x38] sm:$0xff]  ;;  %v29_v4 = vld [vmem:[%s362_s1] sm:$0xff]  ;;  %v75_v5 = vld [vmem:[%s364_s3 + $0x30] sm:$0xff] }
   0x3   :  { %v27_v6 = vld [vmem:[%s361_s0] sm:$0xff]  ;;  %96 = vmatpush.msra.mxu1 %v76_v3  ;;  %204 = vmatpush.msra.mxu2 %v76_v3  ;;  %v28_v7 = vld [vmem:[%s361_s0 + $0x8] sm:$0xff] }
   0x4   :  { %57 = vmatpush.msra.mxu0 %v31_v1  ;;  %201 = vmatpush.msra.mxu3 %v31_v1 }
   0x6   :  { %58 = vmatpush.msra.mxu0 %v30_v2  ;;  %202 = vmatpush.msra.mxu3 %v30_v2 }
   0x7   :  { %12 = vsyncpa [#allocation3], 0  ;;  %97 = vmatpush.msra.mxu1 %v75_v5  ;;  %v74_v8 = vld [vmem:[%s364_s3 + $0x28] sm:$0xff]  ;;  %205 = vmatpush.msra.mxu2 %v75_v5  ;;  %v73_v9 = vld [vmem:[%s364_s3 + $0x20] sm:$0xff]  ;;  %vm81_vm1 = vcmask 523264   ;;  %v252_v30 = vmov 32.0  }
   0x8   :  { %59 = vmatpush.msra.mxu0 %v29_v4  ;;  %203 = vmatpush.msra.mxu3 %v29_v4  ;;  %v72_v10 = vld [vmem:[%s364_s3 + $0x18] sm:$0xff]  ;;  %v71_v11 = vld [vmem:[%s364_s3 + $0x10] sm:$0xff]  ;;  %v70_v12 = vld [vmem:[%s364_s3 + $0x8] sm:$0xff]  ;;  %220 = vrcp.f32 %v252_v30  ;;  %s254_s12 = smov 128   ;;  %s255_s13 = smov 8  }
   0x9   :  { %196 = vmatmul.msk.f32.vlgmr.msra.gmra.mxu0 %vm37_vm0, %v27_v6  ;;  %197 = vmatmul.msk.f32.vlgmr.msra.gmra.mxu3 %vm37_vm0, %v28_v7  ;;  %v69_v13 = vld [vmem:[%s364_s3] sm:$0xff] }
   0xa   :  { %98 = vmatpush.msra.mxu1 %v74_v8  ;;  %206 = vmatpush.msra.mxu2 %v74_v8  ;;  %v216_v14 = vld [vmem:[%s363_s2] ss:$0 sm:$0xff] }
   0xb   :  { %v217_v21 = vld [vmem:[%s365_s4] ss:$0 sm:$0xff] }
   0xc   :  { %99 = vmatpush.msra.mxu1 %v73_v9  ;;  %207 = vmatpush.msra.mxu2 %v73_v9  ;;  %v218_v59 = vld [vmem:[%s366_s5] ss:$0 sm:$0xff]  ;;  %s253_s5 = smov [#allocation2]  }
   0xd   :  { %v219_v63 = vld [vmem:[%s367_s6] ss:$0 sm:$0xff]  ;;  %s182_s9 = sshll.u32 %s253_s5, 4  ;;  %s184_s6 = sshll.u32 %s368_s7, 4  ;;  %s183_s9 = int_to_ptr.vmem [resolvable:$true] %s182_s9  ;;  %s185_s6 = int_to_ptr.hbm [resolvable:$true] %s184_s6 }
   0xe   :  { %100 = vmatpush.msra.mxu1 %v72_v10  ;;  %208 = vmatpush.msra.mxu2 %v72_v10  ;;  %v221_v31 = vpop.eup %220 }
   0xf   :  { %v120_v32 = vmul.f32 32.0, %v221_v31  ;;  %vm124_vm2 = vweird.f32 %v221_v31 }
  0x10   :  { %101 = vmatpush.msra.mxu1 %v71_v11  ;;  %209 = vmatpush.msra.mxu2 %v71_v11 }
  0x11   :  { %v121_v33 = vsub.f32 1.0, %v120_v32 }
  0x12   :  { %102 = vmatpush.msra.mxu1 %v70_v12  ;;  %210 = vmatpush.msra.mxu2 %v70_v12 }
  0x13   :  { %v122_v34 = vmul.f32 %v221_v31, %v121_v33 }
  0x14   :  { %103 = vmatpush.msra.mxu1 %v69_v13  ;;  %211 = vmatpush.msra.mxu2 %v69_v13 }
  0x15   :  { %v123_v35 = vadd.f32 %v221_v31, %v122_v34 }
  0x17   :  { %v125_v36 = vsel %vm124_vm2, %v221_v31, %v123_v35 }
  0x86   :  { %v61_v15 = vpop.f32.mrf.mxu0 }
  0x87   :  { %v62_v16 = vadd.f32 %v216_v14, %v61_v15 }
  0x89   :  { %v67_v17 = vmax.f32 %v62_v16, 0.0 }
  0x8b   :  { %198 = vmatmul.msk.f32.vlgmr.msra.gmra.mxu1 %vm81_vm1, %v67_v17 }
  0x8c   :  { %v64_v18 = vpop.f32.mrf.mxu3 }
  0x8d   :  { %v65_v19 = vadd.f32 %v216_v14, %v64_v18 }
  0x8f   :  { %v68_v20 = vmax.f32 %v65_v19, 0.0 }
  0x91   :  { %199 = vmatmul.msk.f32.vlgmr.msra.gmra.mxu2 %vm81_vm1, %v68_v20 }
 0x108   :  { %v105_v22 = vpop.f32.mrf.mxu1 }
 0x109   :  { %v106_v23 = vadd.f32 %v217_v21, %v105_v22 }
 0x10b   :  { %v111_v24 = vadd.f32 %v106_v23, %v27_v6 }
 0x10d   :  { %v113_v25 = vsel %vm37_vm0, %v111_v24, 0.0 }
 0x10e   :  { %114 = vadd.xlane.f32.xlu0 %v113_v25 }
 0x114   :  { %v108_v26 = vpop.f32.mrf.mxu2 }
 0x115   :  { %v109_v27 = vadd.f32 %v217_v21, %v108_v26 }
 0x117   :  { %v112_v28 = vadd.f32 %v109_v27, %v28_v7 }
 0x119   :  { %v116_v29 = vsel %vm37_vm0, %v112_v28, 0.0 }
 0x11a   :  { %117 = vadd.xlane.f32.xlu0 %v116_v29 }
 0x181   :  { %v115_v37 = vpop.xlane.xlu0 %114 }
 0x182   :  { %v126_v38 = vmul.f32 %v125_v36, %v115_v37 }
 0x184   :  { %v128_v39 = vsub.f32 %v111_v24, %v126_v38 }
 0x186   :  { %v130_v40 = vmul.f32 %v128_v39, %v128_v39 }
 0x188   :  { %v132_v41 = vsel %vm37_vm0, %v130_v40, 0.0 }
 0x189   :  { %133 = vadd.xlane.f32.xlu1 %v132_v41 }
 0x18d   :  { %v118_v42 = vpop.xlane.xlu0 %117 }
 0x18e   :  { %v127_v43 = vmul.f32 %v125_v36, %v118_v42 }
 0x190   :  { %v129_v44 = vsub.f32 %v112_v28, %v127_v43 }
 0x192   :  { %v131_v45 = vmul.f32 %v129_v44, %v129_v44 }
 0x194   :  { %v135_v46 = vsel %vm37_vm0, %v131_v45, 0.0 }
 0x195   :  { %136 = vadd.xlane.f32.xlu1 %v135_v46 }
 0x1fc   :  { %v134_v47 = vpop.xlane.xlu1 %133 }
 0x1fd   :  { %v138_v48 = vmul.f32 %v134_v47, %v125_v36 }
 0x1ff   :  { %v140_v49 = vadd.f32 1e-05, %v138_v48 }
 0x201   :  { %222 = vrsqrt.f32 %v140_v49  ;;  %vm148_vm4 = vweird.f32 %v140_v49 }
 0x207   :  { %v223_v50 = vpop.eup %222 }
 0x208   :  { %v143_v51 = vmul.f32 %v223_v50, %v140_v49  ;;  %v137_v52 = vpop.xlane.xlu1 %136  ;;  %vm149_vm3 = vweird.f32 %v223_v50 }
 0x209   :  { %v139_v53 = vmul.f32 %v137_v52, %v125_v36  ;;  %vm150_vm5 = vmor %vm148_vm4, %vm149_vm3 }
 0x20a   :  { %v144_v54 = vmul.f32 %v223_v50, %v143_v51 }
 0x20b   :  { %v141_v55 = vadd.f32 1e-05, %v139_v53 }
 0x20c   :  { %v145_v56 = vmul.f32 0.5, %v144_v54 }
 0x20d   :  { %224 = vrsqrt.f32 %v141_v55  ;;  %vm158_vm7 = vweird.f32 %v141_v55 }
 0x20e   :  { %v146_v57 = vsub.f32 1.5, %v145_v56 }
 0x210   :  { %v147_v58 = vmul.f32 %v223_v50, %v146_v57 }
 0x212   :  { %v151_v60 = vsel %vm150_vm5, %v223_v50, %v147_v58 }
 0x213   :  { %v225_v61 = vpop.eup %224  ;;  %v162_v62 = vmul.f32 %v151_v60, %v128_v39 }
 0x214   :  { %v153_v0 = vmul.f32 %v225_v61, %v141_v55  ;;  %vm159_vm6 = vweird.f32 %v225_v61 }
 0x215   :  { %v168_v1 = vmul.f32 %v218_v59, %v162_v62  ;;  %vm160_vm8 = vmor %vm158_vm7, %vm159_vm6 }
 0x216   :  { %v154_v2 = vmul.f32 %v225_v61, %v153_v0 }
 0x217   :  { %v174_v3 = vadd.f32 %v219_v63, %v168_v1 }
 0x218   :  { %v155_v4 = vmul.f32 0.5, %v154_v2 }
 0x219   :  { %176 = vst.msk [vmem:[#allocation2] sm:$0xff] %vm37_vm0, %v174_v3 }
 0x21a   :  { %v156_v5 = vsub.f32 1.5, %v155_v4 }
 0x21c   :  { %v157_v6 = vmul.f32 %v225_v61, %v156_v5 }
 0x21e   :  { %v161_v7 = vsel %vm160_vm8, %v225_v61, %v157_v6 }
 0x21f   :  { %v163_v8 = vmul.f32 %v161_v7, %v129_v44 }
 0x221   :  { %v169_v9 = vmul.f32 %v218_v59, %v163_v8 }
 0x223   :  { %v175_v10 = vadd.f32 %v219_v63, %v169_v9 }
 0x225   :  { %177 = vst.msk [vmem:[#allocation2 + $0x8] sm:$0xff] %vm37_vm0, %v175_v10 }
 0x226   :  { %190 = dma.vmem_to_hbm [thread:$0]  %s183_s9, 256, %s185_s6, [#allocation3], %s254_s12, %s254_s12, %s255_s13  }
 0x227   :  { %250 = dma.done.wait [#allocation3], 256  }
 0x228   :  { %251 = vsyncadd [#allocation3], 4294967040 }
 0x229   :  { %195 = vsyncpa [#allocation3], 1 }

</bundles_post_ra>
